<compile_context>
chip_gen: v7x
topology: tpu7x:2x2x1
jax: 0.10.0
libtpu: 0.0.40
codegen_flags: <defaults>
</compile_context>

<pallas_src>
import jax
import jax.numpy as jnp
from jax.experimental import pallas as pl
from jax.experimental.pallas import tpu as pltpu


def _round_up(x, m):
    return ((x + m - 1) // m) * m


def _generator_kernel(x_ref, w1_ref, b1_ref, w2_ref, b2_ref, w3_ref, b3_ref,
                      o_ref):
    """Fused 3-layer MLP on one batch tile. bf16 MXU operands, f32 accumulate."""
    bf = jnp.bfloat16
    x = x_ref[...].astype(bf)                                   # (TB, 128) K-padded

    # Layer 1: single aligned K=128 matmul (zero-padded lanes contribute 0).
    h1 = jnp.dot(x, w1_ref[...], preferred_element_type=jnp.float32)
    h1 = jnp.maximum(h1.astype(bf) + b1_ref[...], 0.0)          # bf16 bias + ReLU

    # Layer 2.
    h2 = jnp.dot(h1, w2_ref[...], preferred_element_type=jnp.float32)
    h2 = jnp.maximum(h2.astype(bf) + b2_ref[...], 0.0)

    # Layer 3 (no activation), lane-dense padded output (TB, 128).
    out = jnp.dot(h2, w3_ref[...], preferred_element_type=jnp.float32)
    o_ref[...] = (out + b3_ref[...]).astype(o_ref.dtype)


def prepare_generator_params(params):
    """One-time weight prep: bf16 cast + lane/contraction padding.

    Call ONCE outside the training/inference step (not inside the jitted
    forward) so the convert/pad passes are not re-run per call.
    """
    bf = jnp.bfloat16
    w1, b1 = params["w1"], params["b1"]
    w2, b2 = params["w2"], params["b2"]
    w3, b3 = params["w3"], params["b3"]

    d_in = w1.shape[0]
    out_dim = w3.shape[1]
    d_in_pad = _round_up(max(d_in, 128), 128)     # layer-1 contraction, lane-aligned
    out_pad = _round_up(max(out_dim, 128), 128)   # lane-dense output width

    return {
        "w1": jnp.pad(w1, ((0, d_in_pad - d_in), (0, 0))).astype(bf),
        "b1": b1.astype(bf),
        "w2": w2.astype(bf),
        "b2": b2.astype(bf),
        "w3": jnp.pad(w3, ((0, 0), (0, out_pad - out_dim))).astype(bf),
        "b3": b3,                                  # unpadded f32; out_dim recoverable
    }


@jax.jit
def generator_forward(z, cond, prepped):
    """z: (B, z_dim), cond: (B, cond_dim) -> (B, output_dim), float32."""
    B, z_dim = z.shape
    cond_dim = cond.shape[1]
    w1, b1 = prepped["w1"], prepped["b1"]
    w2, b2 = prepped["w2"], prepped["b2"]
    w3, b3 = prepped["w3"], prepped["b3"]

    d_in = z_dim + cond_dim
    d_in_pad = w1.shape[0]
    out_pad = w3.shape[1]
    out_dim = b3.shape[1]
    b3p = jnp.pad(b3, ((0, 0), (0, out_pad - out_dim)))          # tiny, fused by XLA

    # Batch tiling: up to 512 rows/tile (amortizes ~0.35us/step grid overhead,
    # still < a few MiB of VMEM); tiny batches shrink to the 8-padded batch.
    tb_target = 512
    b_pad8 = _round_up(B, 8)
    if b_pad8 >= tb_target:
        tb = tb_target
        b_pad = _round_up(b_pad8, tb)
    else:
        tb = b_pad8
        b_pad = b_pad8

    # Lane-dense, K-padded input slab [z | cond | 0...] -> (b_pad, d_in_pad).
    x = jnp.concatenate([z, cond], axis=1)
    pad_rows, pad_cols = b_pad - B, d_in_pad - d_in
    if pad_rows or pad_cols:
        x = jnp.pad(x, ((0, pad_rows), (0, pad_cols)))

    batch_spec = lambda d: pl.BlockSpec((tb, d), lambda i: (i, 0))
    const_spec = lambda a: pl.BlockSpec(a.shape, lambda i: (0, 0))

    out = pl.pallas_call(
        _generator_kernel,
        out_shape=jax.ShapeDtypeStruct((b_pad, out_pad), jnp.float32),
        grid=(b_pad // tb,),
        in_specs=[
            batch_spec(d_in_pad),        # x tile
            const_spec(w1), const_spec(b1),
            const_spec(w2), const_spec(b2),
            const_spec(w3), const_spec(b3p),
        ],
        out_specs=batch_spec(out_pad),
        compiler_params=pltpu.CompilerParams(
            dimension_semantics=("parallel",),
        ),
    )(x, w1, b1, w2, b2, w3, b3p)

    return out[:B, :out_dim]


def init_generator_params(key, z_dim, cond_dim, output_dim, n_features=64):
    """Matches PyTorch nn.Linear default init (uniform +-1/sqrt(fan_in)).

    Weights stored transposed vs PyTorch: (in_features, out_features), f32.
    Biases stored as (1, out_features), f32.
    """
    d_in = z_dim + cond_dim
    h1 = n_features * 4
    h2 = n_features * 8
    dims = [(d_in, h1), (h1, h2), (h2, output_dim)]
    params = {}
    for i, (fan_in, fan_out) in enumerate(dims, start=1):
        key, kw, kb = jax.random.split(key, 3)
        bound = 1.0 / jnp.sqrt(jnp.float32(fan_in))
        params[f"w{i}"] = jax.random.uniform(
            kw, (fan_in, fan_out), jnp.float32, minval=-bound, maxval=bound)
        params[f"b{i}"] = jax.random.uniform(
            kb, (1, fan_out), jnp.float32, minval=-bound, maxval=bound)
    return params


def _reference_forward(z, cond, params):
    """Plain-JAX reference with matching bf16-operand / bf16-elementwise math."""
    bf = jnp.bfloat16
    x = jnp.concatenate([z, cond], axis=1).astype(bf)
    h1 = jnp.dot(x, params["w1"].astype(bf), preferred_element_type=jnp.float32)
    h1 = jnp.maximum(h1.astype(bf) + params["b1"].astype(bf), 0.0)
    h2 = jnp.dot(h1, params["w2"].astype(bf), preferred_element_type=jnp.float32)
    h2 = jnp.maximum(h2.astype(bf) + params["b2"].astype(bf), 0.0)
    out = jnp.dot(h2, params["w3"].astype(bf), preferred_element_type=jnp.float32)
    return out + params["b3"]


if __name__ == "__main__":
    # Small but representative shapes.
    B, Z_DIM, COND_DIM, OUT_DIM, NF = 8, 16, 8, 32, 64

    key = jax.random.PRNGKey(0)
    key, kz, kc, kp = jax.random.split(key, 4)
    z = jax.random.normal(kz, (B, Z_DIM), jnp.float32)
    cond = jax.random.normal(kc, (B, COND_DIM), jnp.float32)
    params = init_generator_params(kp, Z_DIM, COND_DIM, OUT_DIM, NF)

    prepped = prepare_generator_params(params)    # one-time bf16 cast + padding
    out = generator_forward(z, cond, prepped)
    out = jax.block_until_ready(out)

    ref = _reference_forward(z, cond, params)
    assert out.shape == (B, OUT_DIM), out.shape
    assert jnp.allclose(out, ref, atol=5e-3, rtol=5e-3), "mismatch vs JAX reference"

    print("KERNEL_OK")
</pallas_src>

<mosaic_0001>
module attributes {stable_mosaic.version = 11 : i64} {
  func.func @_generator_kernel(%arg0: i32, %arg1: memref<8x128xf32, #tpu.memory_space<vmem>>, %arg2: memref<128x256xbf16, #tpu.memory_space<vmem>>, %arg3: memref<1x256xbf16, #tpu.memory_space<vmem>>, %arg4: memref<256x512xbf16, #tpu.memory_space<vmem>>, %arg5: memref<1x512xbf16, #tpu.memory_space<vmem>>, %arg6: memref<512x128xbf16, #tpu.memory_space<vmem>>, %arg7: memref<1x128xf32, #tpu.memory_space<vmem>>, %arg8: memref<8x128xf32, #tpu.memory_space<vmem>>) attributes {dimension_semantics = [#tpu.dimension_semantics<parallel>], iteration_bounds = array<i64: 1>, scalar_prefetch = 0 : i64, scratch_operands = 0 : i64, tpu.core_type = #tpu.core_type<tc>, window_params = [{transform_indices = @transform_0, window_bounds = array<i64: 8, 128>}, {pipeline_mode = #tpu.pipeline_mode<synchronous>, transform_indices = @transform_1, window_bounds = array<i64: 128, 256>}, {pipeline_mode = #tpu.pipeline_mode<synchronous>, transform_indices = @transform_2, window_bounds = array<i64: 1, 256>}, {pipeline_mode = #tpu.pipeline_mode<synchronous>, transform_indices = @transform_3, window_bounds = array<i64: 256, 512>}, {pipeline_mode = #tpu.pipeline_mode<synchronous>, transform_indices = @transform_4, window_bounds = array<i64: 1, 512>}, {pipeline_mode = #tpu.pipeline_mode<synchronous>, transform_indices = @transform_5, window_bounds = array<i64: 512, 128>}, {pipeline_mode = #tpu.pipeline_mode<synchronous>, transform_indices = @transform_6, window_bounds = array<i64: 1, 128>}, {transform_indices = @transform_7, window_bounds = array<i64: 8, 128>}]} {
    %c0 = arith.constant 0 : index
    %c0_0 = arith.constant 0 : index
    %0 = vector.load %arg1[%c0, %c0_0] : memref<8x128xf32, #tpu.memory_space<vmem>>, vector<8x128xf32>
    %1 = arith.truncf %0 : vector<8x128xf32> to vector<8x128xbf16>
    %c0_1 = arith.constant 0 : index
    %c0_2 = arith.constant 0 : index
    %2 = vector.load %arg2[%c0_1, %c0_2] : memref<128x256xbf16, #tpu.memory_space<vmem>>, vector<128x256xbf16>
    %cst = arith.constant dense<0.000000e+00> : vector<8x256xf32>
    %3 = tpu.matmul %1, %2, %cst {dimension_numbers = #tpu.dot_dimension_numbers<[1], [0], [0], [1], [0, 0, 1, 1], [], []>} : vector<8x128xbf16>, vector<128x256xbf16>, vector<8x256xf32> -> vector<8x256xf32>
    %4 = arith.truncf %3 : vector<8x256xf32> to vector<8x256xbf16>
    %c0_3 = arith.constant 0 : index
    %c0_4 = arith.constant 0 : index
    %5 = vector.load %arg3[%c0_3, %c0_4] : memref<1x256xbf16, #tpu.memory_space<vmem>>, vector<1x256xbf16>
    %6 = vector.broadcast %5 : vector<1x256xbf16> to vector<8x256xbf16>
    %7 = arith.addf %4, %6 : vector<8x256xbf16>
    %cst_5 = arith.constant 0.000000e+00 : bf16
    %8 = vector.broadcast %cst_5 : bf16 to vector<8x256xbf16>
    %9 = arith.maximumf %7, %8 : vector<8x256xbf16>
    %c0_6 = arith.constant 0 : index
    %c0_7 = arith.constant 0 : index
    %10 = vector.load %arg4[%c0_6, %c0_7] : memref<256x512xbf16, #tpu.memory_space<vmem>>, vector<256x512xbf16>
    %cst_8 = arith.constant dense<0.000000e+00> : vector<8x512xf32>
    %11 = tpu.matmul %9, %10, %cst_8 {dimension_numbers = #tpu.dot_dimension_numbers<[1], [0], [0], [1], [0, 0, 1, 1], [], []>} : vector<8x256xbf16>, vector<256x512xbf16>, vector<8x512xf32> -> vector<8x512xf32>
    %12 = arith.truncf %11 : vector<8x512xf32> to vector<8x512xbf16>
    %c0_9 = arith.constant 0 : index
    %c0_10 = arith.constant 0 : index
    %13 = vector.load %arg5[%c0_9, %c0_10] : memref<1x512xbf16, #tpu.memory_space<vmem>>, vector<1x512xbf16>
    %14 = vector.broadcast %13 : vector<1x512xbf16> to vector<8x512xbf16>
    %15 = arith.addf %12, %14 : vector<8x512xbf16>
    %cst_11 = arith.constant 0.000000e+00 : bf16
    %16 = vector.broadcast %cst_11 : bf16 to vector<8x512xbf16>
    %17 = arith.maximumf %15, %16 : vector<8x512xbf16>
    %c0_12 = arith.constant 0 : index
    %c0_13 = arith.constant 0 : index
    %18 = vector.load %arg6[%c0_12, %c0_13] : memref<512x128xbf16, #tpu.memory_space<vmem>>, vector<512x128xbf16>
    %cst_14 = arith.constant dense<0.000000e+00> : vector<8x128xf32>
    %19 = tpu.matmul %17, %18, %cst_14 {dimension_numbers = #tpu.dot_dimension_numbers<[1], [0], [0], [1], [0, 0, 1, 1], [], []>} : vector<8x512xbf16>, vector<512x128xbf16>, vector<8x128xf32> -> vector<8x128xf32>
    %c0_15 = arith.constant 0 : index
    %c0_16 = arith.constant 0 : index
    %20 = vector.load %arg7[%c0_15, %c0_16] : memref<1x128xf32, #tpu.memory_space<vmem>>, vector<1x128xf32>
    %21 = vector.broadcast %20 : vector<1x128xf32> to vector<8x128xf32>
    %22 = arith.addf %19, %21 : vector<8x128xf32>
    %c0_17 = arith.constant 0 : index
    %c0_18 = arith.constant 0 : index
    %23 = vector.load %arg8[%c0_17, %c0_18] : memref<8x128xf32, #tpu.memory_space<vmem>>, vector<8x128xf32>
    tpu.vector_store %arg8[%c0_17, %c0_18], %22 {strides = array<i32>} : memref<8x128xf32, #tpu.memory_space<vmem>>, vector<8x128xf32>,
    return
  }
  func.func @transform_0(%arg0: i32) -> (i32, i32) {
    %c0_i32 = arith.constant 0 : i32
    %c0_i32_0 = arith.constant 0 : i32
    return %arg0, %c0_i32 : i32, i32
  }
  func.func @transform_1(%arg0: i32) -> (i32, i32) {
    %c0_i32 = arith.constant 0 : i32
    %c0_i32_0 = arith.constant 0 : i32
    %c0_i32_1 = arith.constant 0 : i32
    return %c0_i32, %c0_i32_0 : i32, i32
  }
  func.func @transform_2(%arg0: i32) -> (i32, i32) {
    %c0_i32 = arith.constant 0 : i32
    %c0_i32_0 = arith.constant 0 : i32
    %c0_i32_1 = arith.constant 0 : i32
    return %c0_i32, %c0_i32_0 : i32, i32
  }
  func.func @transform_3(%arg0: i32) -> (i32, i32) {
    %c0_i32 = arith.constant 0 : i32
    %c0_i32_0 = arith.constant 0 : i32
    %c0_i32_1 = arith.constant 0 : i32
    return %c0_i32, %c0_i32_0 : i32, i32
  }
  func.func @transform_4(%arg0: i32) -> (i32, i32) {
    %c0_i32 = arith.constant 0 : i32
    %c0_i32_0 = arith.constant 0 : i32
    %c0_i32_1 = arith.constant 0 : i32
    return %c0_i32, %c0_i32_0 : i32, i32
  }
  func.func @transform_5(%arg0: i32) -> (i32, i32) {
    %c0_i32 = arith.constant 0 : i32
    %c0_i32_0 = arith.constant 0 : i32
    %c0_i32_1 = arith.constant 0 : i32
    return %c0_i32, %c0_i32_0 : i32, i32
  }
  func.func @transform_6(%arg0: i32) -> (i32, i32) {
    %c0_i32 = arith.constant 0 : i32
    %c0_i32_0 = arith.constant 0 : i32
    %c0_i32_1 = arith.constant 0 : i32
    return %c0_i32, %c0_i32_0 : i32, i32
  }
  func.func @transform_7(%arg0: i32) -> (i32, i32) {
    %c0_i32 = arith.constant 0 : i32
    %c0_i32_0 = arith.constant 0 : i32
    return %arg0, %c0_i32 : i32, i32
  }
}

</mosaic_0001>

<bundles_post_ra>
// kernel: generator_forward.1
= control target key start
LH: loop header
LB: loop body
LE: loop exit
PB: predicated region body
PF: predicated region fallthrough
CT: control target
= control target key end

     0   :  { %12 = vsyncpa [#allocation3], 0  ;;  %s1694_s0 = inlined_call_operand.vmem [shape: f32[8,128], index: 0, kind: input, shape index: {}]   ;;  %s1695_s1 = inlined_call_operand.hbm [shape: bf16[128,256], index: 1, kind: input, shape index: {}]   ;;  %s1696_s2 = inlined_call_operand.vmem [shape: bf16[1,256], index: 2, kind: input, shape index: {}]   ;;  %s1697_s3 = inlined_call_operand.hbm [shape: bf16[256,512], index: 3, kind: input, shape index: {}]   ;;  %s1698_s4 = inlined_call_operand.vmem [shape: bf16[1,512], index: 4, kind: input, shape index: {}]   ;;  %s1699_s5 = inlined_call_operand.hbm [shape: bf16[512,128], index: 5, kind: input, shape index: {}]   ;;  %s1700_s6 = inlined_call_operand.vmem [shape: f32[1,128], index: 6, kind: input, shape index: {}]   ;;  %s1701_s7 = inlined_call_operand.hbm [shape: f32[8,128], index: 7, kind: output, shape index: {}]  }
   0x1   :  { %13 = vsyncpa [#allocation6], 0 }
   0x2   :  { %14 = vsyncpa [#allocation4], 0  ;;  %s1561_s24 = smov [#allocation5]   ;;  %s1467_s28 = scalar_lea.hbm %s1697_s3, 8192 }
   0x3   :  { %s36_s25 = sshll.u32 %s1561_s24, 4  ;;  %p1468_p0 = scmp.ne.s32.totalorder %s1697_s3, %s1467_s28  ;;  %s37_s25 = int_to_ptr.vmem [resolvable:$true] %s36_s25 }
   0x4   :  { %p1471_p1 = scmp.lt.u32.totalorder %s1467_s28, %s1697_s3 }
   0x6   :  { %p1473_p2 = pnand %p1471_p1, %p1468_p0 }
   0x8   :  { %1476 = shalt.err (!%p1473_p2)
}
   0x9   :  { %s1477_s10 = scalar_lea.vmem %s37_s25, 8192  ;;  %p1482_p4 = scmp.lt.s32.totalorder %s37_s25, %s37_s25 }
   0xa   :  { %p1478_p3 = scmp.ne.s32.totalorder %s37_s25, %s1477_s10  ;;  %p1483_p5 = scmp.lt.s32.totalorder %s1477_s10, %s1477_s10 }
   0xc   :  { %p1484_p6 = por %p1483_p5, %p1482_p4 }
   0xe   :  { %p1485_p7 = pnand %p1484_p6, %p1478_p3 }
  0x10   :  { %1488 = shalt.err (!%p1485_p7)
}
  0x11   :  { %s1562_s11 = smov 256   ;;  %s1563_s12 = smov 16  }
  0x12   :  { %42 = dma.hbm_to_vmem [thread:$0]  %s1697_s3, 8192, %s37_s25, [#allocation6], %s1562_s11, %s1562_s11, %s1563_s12  }
  0x13   :  { %s1564_s15 = smov [#allocation2]   ;;  %s1489_s19 = scalar_lea.hbm %s1695_s1, 2048 }
  0x14   :  { %s22_s16 = sshll.u32 %s1564_s15, 4  ;;  %p1490_p8 = scmp.ne.s32.totalorder %s1695_s1, %s1489_s19  ;;  %s23_s16 = int_to_ptr.vmem [resolvable:$true] %s22_s16 }
  0x15   :  { %p1493_p9 = scmp.lt.u32.totalorder %s1489_s19, %s1695_s1 }
  0x17   :  { %p1495_p10 = pnand %p1493_p9, %p1490_p8 }
  0x19   :  { %1498 = shalt.err (!%p1495_p10)
}
  0x1a   :  { %s1499_s24 = scalar_lea.vmem %s23_s16, 2048  ;;  %p1504_p12 = scmp.lt.s32.totalorder %s23_s16, %s23_s16 }
  0x1b   :  { %p1500_p11 = scmp.ne.s32.totalorder %s23_s16, %s1499_s24  ;;  %p1505_p13 = scmp.lt.s32.totalorder %s1499_s24, %s1499_s24 }
  0x1d   :  { %p1506_p0 = por %p1505_p13, %p1504_p12 }
  0x1f   :  { %p1507_p1 = pnand %p1506_p0, %p1500_p11 }
  0x21   :  { %1510 = shalt.err (!%p1507_p1)
}
  0x22   :  { %s1565_s3 = smov 128   ;;  %s1566_s25 = smov 8  }
  0x23   :  { %28 = dma.hbm_to_vmem [thread:$0]  %s1695_s1, 2048, %s23_s16, [#allocation3], %s1565_s3, %s1565_s3, %s1566_s25  }
  0x24   :  { %s1567_s28 = smov [#allocation7]   ;;  %s1511_s9 = scalar_lea.hbm %s1699_s5, 4096 }
  0x25   :  { %s50_s29 = sshll.u32 %s1567_s28, 4  ;;  %p1512_p2 = scmp.ne.s32.totalorder %s1699_s5, %s1511_s9  ;;  %s51_s29 = int_to_ptr.vmem [resolvable:$true] %s50_s29 }
  0x26   :  { %p1515_p3 = scmp.lt.u32.totalorder %s1511_s9, %s1699_s5 }
  0x28   :  { %p1517_p4 = pnand %p1515_p3, %p1512_p2 }
  0x2a   :  { %1520 = shalt.err (!%p1517_p4)
}
  0x2b   :  { %s1521_s14 = scalar_lea.vmem %s51_s29, 4096  ;;  %p1526_p6 = scmp.lt.s32.totalorder %s51_s29, %s51_s29 }
  0x2c   :  { %p1522_p5 = scmp.ne.s32.totalorder %s51_s29, %s1521_s14  ;;  %p1527_p7 = scmp.lt.s32.totalorder %s1521_s14, %s1521_s14 }
  0x2e   :  { %p1528_p8 = por %p1527_p7, %p1526_p6 }
  0x30   :  { %p1529_p9 = pnand %p1528_p8, %p1522_p5 }
  0x32   :  { %1532 = shalt.err (!%p1529_p9)
}
  0x33   :  { %s1568_s1 = smov 64   ;;  %s1569_s15 = smov 4  }
  0x34   :  { %56 = dma.hbm_to_vmem [thread:$0]  %s1699_s5, 4096, %s51_s29, [#allocation6], %s1568_s1, %s1568_s1, %s1569_s15  }
  0x35   :  { %1555 = dma.done.wait [#allocation3], 2048  }
  0x36   :  { %1556 = vsyncadd [#allocation3], 4294965248 }
  0x37   :  { %1557 = dma.done.wait [#allocation6], 12288  }
  0x38   :  { %1558 = vsyncadd [#allocation6], 4294955008  ;;  %v1570_v0 = vmov 0   ;;  %v1315_v1 = vld [vmem:[#allocation2 + $0x4] ss:$8 sps:$4 sm:$0xff]   ;;  %s1572_s22 = smov [#allocation8]  }
  0x39   :  { %199 = vmatprep.mubr.bf16.mxu0 %v1570_v0  ;;  %v1317_v2 = vld [vmem:[#allocation2] ss:$8 sps:$4 sm:$0xff]   ;;  %167 = vmatprep.subr.bf16.mxu0 %v1315_v1  ;;  %v1318_v3 = vld [vmem:[#allocation2 + $0x14] ss:$8 sps:$4 sm:$0xff]   ;;  %v1320_v4 = vld [vmem:[#allocation2 + $0x10] ss:$8 sps:$4 sm:$0xff]  }
  0x3a   :  { %168 = vmatpush1.bf16.msra.mxu0 %v1317_v2  ;;  %v1321_v5 = vld [vmem:[#allocation2 + $0x24] ss:$8 sps:$4 sm:$0xff]   ;;  %v1323_v6 = vld [vmem:[#allocation2 + $0x20] ss:$8 sps:$4 sm:$0xff]   ;;  %v1324_v7 = vld [vmem:[#allocation2 + $0x34] ss:$8 sps:$4 sm:$0xff]  }
  0x3b   :  { %169 = vmatprep.subr.bf16.mxu0 %v1318_v3  ;;  %v1326_v8 = vld [vmem:[#allocation2 + $0x30] ss:$8 sps:$4 sm:$0xff]   ;;  %v1339_v9 = vld [vmem:[#allocation5 + $0x4] ss:$16 sps:$4 sm:$0xff]   ;;  %v1329_v13 = vld [vmem:[#allocation2 + $0x40] ss:$8 sps:$4 sm:$0xff]  }
  0x3c   :  { %v1327_v10 = vld [vmem:[#allocation2 + $0x44] ss:$8 sps:$4 sm:$0xff]   ;;  %636 = vmatprep.subr.bf16.mxu1 %v1339_v9  ;;  %v1344_v11 = vld [vmem:[#allocation5] ss:$16 sps:$4 sm:$0xff]   ;;  %v1330_v14 = vld [vmem:[#allocation2 + $0x54] ss:$8 sps:$4 sm:$0xff]  }
  0x3d   :  { %v1345_v12 = vld [vmem:[#allocation5 + $0x24] ss:$16 sps:$4 sm:$0xff]   ;;  %637 = vmatpush1.bf16.msra.mxu1 %v1344_v11  ;;  %v1350_v15 = vld [vmem:[#allocation5 + $0x20] ss:$16 sps:$4 sm:$0xff]   ;;  %v1343_v27 = vld [vmem:[#allocation5 + $0xc] ss:$16 sps:$4 sm:$0xff]  }
  0x3e   :  { %170 = vmatpush1.bf16.msra.mxu0 %v1320_v4  ;;  %638 = vmatprep.subr.bf16.mxu1 %v1345_v12  ;;  %v1351_v16 = vld [vmem:[#allocation5 + $0x44] ss:$16 sps:$4 sm:$0xff]   ;;  %v1332_v17 = vld [vmem:[#allocation2 + $0x50] ss:$8 sps:$4 sm:$0xff]   ;;  %v1335_v21 = vld [vmem:[#allocation2 + $0x60] ss:$8 sps:$4 sm:$0xff]  }
  0x3f   :  { %171 = vmatprep.subr.bf16.mxu0 %v1321_v5  ;;  %v1333_v18 = vld [vmem:[#allocation2 + $0x64] ss:$8 sps:$4 sm:$0xff]   ;;  %v1356_v19 = vld [vmem:[#allocation5 + $0x40] ss:$16 sps:$4 sm:$0xff]   ;;  %v1336_v22 = vld [vmem:[#allocation2 + $0x74] ss:$8 sps:$4 sm:$0xff]  }
  0x40   :  { %v1357_v20 = vld [vmem:[#allocation5 + $0x64] ss:$16 sps:$4 sm:$0xff]   ;;  %v1362_v23 = vld [vmem:[#allocation5 + $0x60] ss:$16 sps:$4 sm:$0xff]   ;;  %v1341_v31 = vld [vmem:[#allocation5 + $0x8] ss:$16 sps:$4 sm:$0xff]  }
  0x41   :  { %639 = vmatpush1.bf16.msra.mxu1 %v1350_v15  ;;  %v1363_v24 = vld [vmem:[#allocation5 + $0x84] ss:$16 sps:$4 sm:$0xff]   ;;  %v1338_v25 = vld [vmem:[#allocation2 + $0x70] ss:$8 sps:$4 sm:$0xff]   ;;  %v1349_v32 = vld [vmem:[#allocation5 + $0x2c] ss:$16 sps:$4 sm:$0xff]  }
  0x42   :  { %172 = vmatpush1.bf16.msra.mxu0 %v1323_v6  ;;  %640 = vmatprep.subr.bf16.mxu1 %v1351_v16  ;;  %v69_v26 = vld [vmem:[%s1694_s0] sm:$0xff]  ;;  %v1347_v35 = vld [vmem:[#allocation5 + $0x28] ss:$16 sps:$4 sm:$0xff]   ;;  %v1355_v36 = vld [vmem:[#allocation5 + $0x4c] ss:$16 sps:$4 sm:$0xff]   ;;  %s1134_s23 = sshll.u32 %s1572_s22, 4  ;;  %s1135_s23 = int_to_ptr.vmem [resolvable:$true] %s1134_s23 }
  0x43   :  { %173 = vmatprep.subr.bf16.mxu0 %v1324_v7  ;;  %v1368_v28 = vld [vmem:[#allocation5 + $0x80] ss:$16 sps:$4 sm:$0xff]   ;;  %v1369_v29 = vld [vmem:[#allocation5 + $0xa4] ss:$16 sps:$4 sm:$0xff]   ;;  %v70_v30 = vpack.c.bf16 %v69_v26, %v69_v26  ;;  %v1353_v39 = vld [vmem:[#allocation5 + $0x48] ss:$16 sps:$4 sm:$0xff]   ;;  %p1538_p11 = scmp.lt.s32.totalorder %s1135_s23, %s1135_s23 }
  0x44   :  { %v1374_v33 = vld [vmem:[#allocation5 + $0xa0] ss:$16 sps:$4 sm:$0xff]   ;;  %v1375_v34 = vld [vmem:[#allocation5 + $0xc4] ss:$16 sps:$4 sm:$0xff]   ;;  %v1361_v40 = vld [vmem:[#allocation5 + $0x6c] ss:$16 sps:$4 sm:$0xff]  }
  0x45   :  { %641 = vmatpush1.bf16.msra.mxu1 %v1356_v19  ;;  %v1380_v37 = vld [vmem:[#allocation5 + $0xc0] ss:$16 sps:$4 sm:$0xff]   ;;  %v1381_v38 = vld [vmem:[#allocation5 + $0xe4] ss:$16 sps:$4 sm:$0xff]   ;;  %v1359_v43 = vld [vmem:[#allocation5 + $0x68] ss:$16 sps:$4 sm:$0xff]  }
  0x46   :  { %174 = vmatpush1.bf16.msra.mxu0 %v1326_v8  ;;  %642 = vmatprep.subr.bf16.mxu1 %v1357_v20  ;;  %v1386_v41 = vld [vmem:[#allocation5 + $0xe0] ss:$16 sps:$4 sm:$0xff]   ;;  %v1387_v42 = vld [vmem:[#allocation5 + $0x104] ss:$16 sps:$4 sm:$0xff]   ;;  %v1367_v44 = vld [vmem:[#allocation5 + $0x8c] ss:$16 sps:$4 sm:$0xff]  }
  0x47   :  { %175 = vmatprep.subr.bf16.mxu0 %v1327_v10  ;;  %v1392_v45 = vld [vmem:[#allocation5 + $0x100] ss:$16 sps:$4 sm:$0xff]   ;;  %v1393_v46 = vld [vmem:[#allocation5 + $0x124] ss:$16 sps:$4 sm:$0xff]   ;;  %v1365_v47 = vld [vmem:[#allocation5 + $0x88] ss:$16 sps:$4 sm:$0xff]  }
  0x48   :  { %v1373_v48 = vld [vmem:[#allocation5 + $0xac] ss:$16 sps:$4 sm:$0xff]   ;;  %v1398_v49 = vld [vmem:[#allocation5 + $0x120] ss:$16 sps:$4 sm:$0xff]   ;;  %v1399_v50 = vld [vmem:[#allocation5 + $0x144] ss:$16 sps:$4 sm:$0xff]  }
  0x49   :  { %643 = vmatpush1.bf16.msra.mxu1 %v1362_v23  ;;  %v1371_v51 = vld [vmem:[#allocation5 + $0xa8] ss:$16 sps:$4 sm:$0xff]   ;;  %v1404_v52 = vld [vmem:[#allocation5 + $0x140] ss:$16 sps:$4 sm:$0xff]   ;;  %v1379_v53 = vld [vmem:[#allocation5 + $0xcc] ss:$16 sps:$4 sm:$0xff]  }
  0x4a   :  { %176 = vmatpush1.bf16.msra.mxu0 %v1329_v13  ;;  %644 = vmatprep.subr.bf16.mxu1 %v1363_v24  ;;  %v1405_v54 = vld [vmem:[#allocation5 + $0x164] ss:$16 sps:$4 sm:$0xff]   ;;  %v1377_v55 = vld [vmem:[#allocation5 + $0xc8] ss:$16 sps:$4 sm:$0xff]   ;;  %v1410_v56 = vld [vmem:[#allocation5 + $0x160] ss:$16 sps:$4 sm:$0xff]   ;;  %v223_v24 = vlaneseq }
  0x4b   :  { %177 = vmatprep.subr.bf16.mxu0 %v1330_v14  ;;  %v1385_v57 = vld [vmem:[#allocation5 + $0xec] ss:$16 sps:$4 sm:$0xff]   ;;  %v1411_v58 = vld [vmem:[#allocation5 + $0x184] ss:$16 sps:$4 sm:$0xff]   ;;  %v1383_v59 = vld [vmem:[#allocation5 + $0xe8] ss:$16 sps:$4 sm:$0xff]  }
  0x4c   :  { %v1416_v60 = vld [vmem:[#allocation5 + $0x180] ss:$16 sps:$4 sm:$0xff]   ;;  %v1391_v61 = vld [vmem:[#allocation5 + $0x10c] ss:$16 sps:$4 sm:$0xff]   ;;  %v1417_v62 = vld [vmem:[#allocation5 + $0x1a4] ss:$16 sps:$4 sm:$0xff]  }
  0x4d   :  { %645 = vmatpush1.bf16.msra.mxu1 %v1368_v28  ;;  %v1389_v63 = vld [vmem:[#allocation5 + $0x108] ss:$16 sps:$4 sm:$0xff]   ;;  %v1422_v1 = vld [vmem:[#allocation5 + $0x1a0] ss:$16 sps:$4 sm:$0xff]   ;;  %v1397_v2 = vld [vmem:[#allocation5 + $0x12c] ss:$16 sps:$4 sm:$0xff]  }
  0x4e   :  { %178 = vmatpush1.bf16.msra.mxu0 %v1332_v17  ;;  %646 = vmatprep.subr.bf16.mxu1 %v1369_v29  ;;  %v1395_v3 = vld [vmem:[#allocation5 + $0x128] ss:$16 sps:$4 sm:$0xff]   ;;  %v1403_v4 = vld [vmem:[#allocation5 + $0x14c] ss:$16 sps:$4 sm:$0xff]   ;;  %v1423_v12 = vld [vmem:[#allocation5 + $0x1c4] ss:$16 sps:$4 sm:$0xff]  }
  0x4f   :  { %179 = vmatprep.subr.bf16.mxu0 %v1333_v18  ;;  %v1401_v5 = vld [vmem:[#allocation5 + $0x148] ss:$16 sps:$4 sm:$0xff]   ;;  %v1409_v6 = vld [vmem:[#allocation5 + $0x16c] ss:$16 sps:$4 sm:$0xff]   ;;  %v1428_v15 = vld [vmem:[#allocation5 + $0x1c0] ss:$16 sps:$4 sm:$0xff]  }
  0x50   :  { %v1407_v7 = vld [vmem:[#allocation5 + $0x168] ss:$16 sps:$4 sm:$0xff]   ;;  %v1415_v8 = vld [vmem:[#allocation5 + $0x18c] ss:$16 sps:$4 sm:$0xff]   ;;  %v1429_v16 = vld [vmem:[#allocation5 + $0x1e4] ss:$16 sps:$4 sm:$0xff]  }
  0x51   :  { %647 = vmatpush1.bf16.msra.mxu1 %v1374_v33  ;;  %v1413_v9 = vld [vmem:[#allocation5 + $0x188] ss:$16 sps:$4 sm:$0xff]   ;;  %v1421_v10 = vld [vmem:[#allocation5 + $0x1ac] ss:$16 sps:$4 sm:$0xff]   ;;  %v1434_v19 = vld [vmem:[#allocation5 + $0x1e0] ss:$16 sps:$4 sm:$0xff]  }
  0x52   :  { %180 = vmatpush1.bf16.msra.mxu0 %v1335_v21  ;;  %648 = vmatprep.subr.bf16.mxu1 %v1375_v34  ;;  %v1419_v11 = vld [vmem:[#allocation5 + $0x1a8] ss:$16 sps:$4 sm:$0xff]   ;;  %v1427_v13 = vld [vmem:[#allocation5 + $0x1cc] ss:$16 sps:$4 sm:$0xff]   ;;  %v1435_v20 = vld [vmem:[#allocation7 + $0x40] sm:$0xff]   ;;  %v224_v26 = vshrl.u32 %v223_v24, 7 }
  0x53   :  { %181 = vmatprep.subr.bf16.mxu0 %v1336_v22  ;;  %v1425_v14 = vld [vmem:[#allocation5 + $0x1c8] ss:$16 sps:$4 sm:$0xff]   ;;  %v1433_v17 = vld [vmem:[#allocation5 + $0x1ec] ss:$16 sps:$4 sm:$0xff]   ;;  %v1436_v21 = vld [vmem:[#allocation7 + $0xc0] sm:$0xff]   ;;  %s1533_s24 = scalar_lea.vmem %s1135_s23, 128 }
  0x54   :  { %v1431_v18 = vld [vmem:[#allocation5 + $0x1e8] ss:$16 sps:$4 sm:$0xff]   ;;  %v1571_v22 = vmov 1966171168   ;;  %v1660_v33 = vsub.s32 0, %v224_v26  ;;  %p1534_p10 = scmp.ne.s32.totalorder %s1135_s23, %s1533_s24  ;;  %p1539_p12 = scmp.lt.s32.totalorder %s1533_s24, %s1533_s24 }
  0x55   :  { %649 = vmatpush1.bf16.msra.mxu1 %v1380_v37  ;;  %v221_v23 = vunpack.c.l.s4 %v1571_v22 }
  0x56   :  { %182 = vmatpush1.bf16.msra.mxu0 %v1338_v25  ;;  %650 = vmatprep.subr.bf16.mxu1 %v1381_v38  ;;  %p1540_p13 = por %p1539_p12, %p1538_p11 }
  0x57   :  { %677 = vmatprep.subr.bf16.mxu0 %v1343_v27  ;;  %v222_v25 = vunpack.c.0.s8 %v221_v23  ;;  %v1160_v27 = vld.sshfl [vmem:[%s1696_s2] sm:$0x11 pattern:$0x75316420] }
  0x58   :  { %v219_v29 = vcombine.high %v1160_v27, %v1160_v27  ;;  %p1541_p0 = pnand %p1540_p13, %p1534_p10 }
  0x59   :  { %200 = vmatmul.mubr.bf16.vlgmr.msra.gmra.mrb[0].mxu0 %v70_v30  ;;  %651 = vmatpush1.bf16.msra.mxu1 %v1386_v41  ;;  %v1656_v28 = vsub.s32 %v222_v25, %v224_v26 }
  0x5a   :  { %678 = vmatpush1.bf16.msra.mxu0 %v1341_v31  ;;  %652 = vmatprep.subr.bf16.mxu1 %v1387_v42 }
  0x5b   :  { %679 = vmatprep.subr.bf16.mxu0 %v1349_v32  ;;  %v226_v30 = vrot.slane %v1160_v27, %v1656_v28  ;;  %v233_v31 = vrot.slane %v219_v29, %v1656_v28 }
  0x5d   :  { %653 = vmatpush1.bf16.msra.mxu1 %v1392_v45  ;;  %v235_v32 = vpack.i.b16 %v226_v30, %v226_v30  ;;  %v242_v34 = vpack.i.b16 %v233_v31, %v233_v31 }
  0x5e   :  { %680 = vmatpush1.bf16.msra.mxu0 %v1347_v35  ;;  %654 = vmatprep.subr.bf16.mxu1 %v1393_v46  ;;  %v1437_v46 = vld [vmem:[#allocation7] sm:$0xff]  }
  0x5f   :  { %681 = vmatprep.subr.bf16.mxu0 %v1355_v36  ;;  %v240_v35 = vrot.slane %v235_v32, %v1660_v33  ;;  %v247_v37 = vrot.slane %v242_v34, %v1660_v33 }
  0x61   :  { %655 = vmatpush1.bf16.msra.mxu1 %v1398_v49  ;;  %v1439_v49 = vld [vmem:[#allocation7 + $0x48] sm:$0xff]  }
  0x62   :  { %682 = vmatpush1.bf16.msra.mxu0 %v1353_v39  ;;  %656 = vmatprep.subr.bf16.mxu1 %v1399_v50  ;;  %v1440_v50 = vld [vmem:[#allocation7 + $0xc8] sm:$0xff]  }
  0x63   :  { %683 = vmatprep.subr.bf16.mxu0 %v1361_v40 }
  0x65   :  { %657 = vmatpush1.bf16.msra.mxu1 %v1404_v52  ;;  %v1442_v52 = vld [vmem:[#allocation7 + $0x88] sm:$0xff]  }
  0x66   :  { %684 = vmatpush1.bf16.msra.mxu0 %v1359_v43  ;;  %658 = vmatprep.subr.bf16.mxu1 %v1405_v54  ;;  %v1444_v54 = vld [vmem:[#allocation7 + $0xd0] sm:$0xff]  }
  0x67   :  { %685 = vmatprep.subr.bf16.mxu0 %v1367_v44 }
  0x69   :  { %659 = vmatpush1.bf16.msra.mxu1 %v1410_v56  ;;  %v1446_v56 = vld [vmem:[#allocation7 + $0x90] sm:$0xff]  }
  0x6a   :  { %686 = vmatpush1.bf16.msra.mxu0 %v1365_v47  ;;  %660 = vmatprep.subr.bf16.mxu1 %v1411_v58  ;;  %v1438_v47 = vld [vmem:[#allocation7 + $0x80] sm:$0xff]   ;;  %v1448_v58 = vld [vmem:[#allocation7 + $0xd8] sm:$0xff]  }
  0x6b   :  { %687 = vmatprep.subr.bf16.mxu0 %v1373_v48 }
  0x6d   :  { %661 = vmatpush1.bf16.msra.mxu1 %v1416_v60  ;;  %v1450_v60 = vld [vmem:[#allocation7 + $0x98] sm:$0xff]  }
  0x6e   :  { %688 = vmatpush1.bf16.msra.mxu0 %v1371_v51  ;;  %662 = vmatprep.subr.bf16.mxu1 %v1417_v62  ;;  %v1441_v51 = vld [vmem:[#allocation7 + $0x8] sm:$0xff]   ;;  %v1452_v62 = vld [vmem:[#allocation7 + $0xe0] sm:$0xff]  }
  0x6f   :  { %689 = vmatprep.subr.bf16.mxu0 %v1379_v53  ;;  %v1443_v53 = vld [vmem:[#allocation7 + $0x50] sm:$0xff]  }
  0x71   :  { %663 = vmatpush1.bf16.msra.mxu1 %v1422_v1  ;;  %v1454_v1 = vld [vmem:[#allocation7 + $0xa0] sm:$0xff]  }
  0x72   :  { %690 = vmatpush1.bf16.msra.mxu0 %v1377_v55  ;;  %664 = vmatprep.subr.bf16.mxu1 %v1423_v12  ;;  %v1445_v55 = vld [vmem:[#allocation7 + $0x10] sm:$0xff]   ;;  %v1465_v12 = vld [vmem:[#allocation7 + $0x38] sm:$0xff]  }
  0x73   :  { %691 = vmatprep.subr.bf16.mxu0 %v1385_v57  ;;  %v1447_v57 = vld [vmem:[#allocation7 + $0x58] sm:$0xff]  }
  0x75   :  { %665 = vmatpush1.bf16.msra.mxu1 %v1428_v15 }
  0x76   :  { %692 = vmatpush1.bf16.msra.mxu0 %v1383_v59  ;;  %666 = vmatprep.subr.bf16.mxu1 %v1429_v16  ;;  %v1449_v59 = vld [vmem:[#allocation7 + $0x18] sm:$0xff]  }
  0x77   :  { %693 = vmatprep.subr.bf16.mxu0 %v1391_v61  ;;  %v1451_v61 = vld [vmem:[#allocation7 + $0x60] sm:$0xff]  }
  0x79   :  { %667 = vmatpush1.bf16.msra.mxu1 %v1434_v19 }
  0x7a   :  { %694 = vmatpush1.bf16.msra.mxu0 %v1389_v63  ;;  %1259 = vmatprep.subr.bf16.mxu1 %v1435_v20  ;;  %v1453_v63 = vld [vmem:[#allocation7 + $0x20] sm:$0xff]  }
  0x7b   :  { %695 = vmatprep.subr.bf16.mxu0 %v1397_v2  ;;  %v1455_v2 = vld [vmem:[#allocation7 + $0x68] sm:$0xff]  }
  0x7e   :  { %696 = vmatpush1.bf16.msra.mxu0 %v1395_v3  ;;  %v1456_v3 = vld [vmem:[#allocation7 + $0xe8] sm:$0xff]  }
  0x7f   :  { %697 = vmatprep.subr.bf16.mxu0 %v1403_v4  ;;  %v1457_v4 = vld [vmem:[#allocation7 + $0x28] sm:$0xff]  }
  0x82   :  { %698 = vmatpush1.bf16.msra.mxu0 %v1401_v5  ;;  %v1458_v5 = vld [vmem:[#allocation7 + $0xa8] sm:$0xff]  }
  0x83   :  { %699 = vmatprep.subr.bf16.mxu0 %v1409_v6  ;;  %v1459_v6 = vld [vmem:[#allocation7 + $0x70] sm:$0xff]  }
  0x86   :  { %700 = vmatpush1.bf16.msra.mxu0 %v1407_v7  ;;  %v1460_v7 = vld [vmem:[#allocation7 + $0xf0] sm:$0xff]  }
  0x87   :  { %701 = vmatprep.subr.bf16.mxu0 %v1415_v8  ;;  %v1461_v8 = vld [vmem:[#allocation7 + $0x30] sm:$0xff]  }
  0x8a   :  { %702 = vmatpush1.bf16.msra.mxu0 %v1413_v9  ;;  %v1462_v9 = vld [vmem:[#allocation7 + $0xb0] sm:$0xff]  }
  0x8b   :  { %703 = vmatprep.subr.bf16.mxu0 %v1421_v10  ;;  %v1463_v10 = vld [vmem:[#allocation7 + $0x78] sm:$0xff]  }
  0x8e   :  { %704 = vmatpush1.bf16.msra.mxu0 %v1419_v11  ;;  %v1464_v11 = vld [vmem:[#allocation7 + $0xf8] sm:$0xff]  }
  0x8f   :  { %705 = vmatprep.subr.bf16.mxu0 %v1427_v13  ;;  %v1466_v13 = vld [vmem:[#allocation7 + $0xb8] sm:$0xff]  }
  0x92   :  { %706 = vmatpush1.bf16.msra.mxu0 %v1425_v14  ;;  %v1225_v14 = vld.sshfl [vmem:[%s1698_s4] sm:$0x33 pattern:$0x75316420] }
  0x93   :  { %707 = vmatprep.subr.bf16.mxu0 %v1433_v17  ;;  %v731_v15 = vcombine.high %v1225_v14, %v1225_v14  ;;  %v738_v16 = vrot.slane %v1225_v14, %v1656_v28 }
  0x95   :  { %v745_v17 = vrot.slane %v731_v15, %v1656_v28  ;;  %v749_v20 = vpack.i.b16 %v738_v16, %v738_v16 }
  0x96   :  { %708 = vmatpush1.bf16.msra.mxu0 %v1431_v18  ;;  %v746_v18 = vcombine.high %v738_v16, %v738_v16 }
  0x97   :  { %1281 = vmatprep.subr.bf16.mxu0 %v1436_v21  ;;  %v747_v19 = vcombine.high %v745_v17, %v745_v17  ;;  %v756_v22 = vpack.i.b16 %v745_v17, %v745_v17  ;;  %v754_v24 = vrot.slane %v749_v20, %v1660_v33 }
  0x98   :  { %v763_v21 = vpack.i.b16 %v746_v18, %v746_v18 }
  0x99   :  { %v770_v23 = vpack.i.b16 %v747_v19, %v747_v19  ;;  %v761_v29 = vrot.slane %v756_v22, %v1660_v33 }
  0x9a   :  { %v768_v25 = vrot.slane %v763_v21, %v1660_v33 }
  0x9b   :  { %v775_v30 = vrot.slane %v770_v23, %v1660_v33 }
 0x12c   :  { %v201_v36 = vpop.f32.mrb[0].mxu0 }
 0x12d   :  { %v208_v38 = vpack.c.bf16 %v201_v36, %v201_v36  ;;  %v203_v39 = vpop.f32.mrb[1].mxu0 }
 0x12e   :  { %v209_v40 = vpack.c.bf16 %v203_v39, %v203_v39  ;;  %v205_v41 = vpop.f32.mrb[2].mxu0 }
 0x12f   :  { %v248_v42 = vadd.bf16 %v240_v35, %v208_v38  ;;  %v206_v43 = vpop.f32.mrb[3].mxu0 }
 0x130   :  { %v249_v44 = vadd.bf16 %v247_v37, %v209_v40 }
 0x131   :  { %v250_v48 = vmax.bf16 %v1570_v0, %v248_v42 }
 0x132   :  { %v251_v45 = vmax.bf16 %v1570_v0, %v249_v44 }
 0x134   :  { %668 = vmatprep.mubr.bf16.mxu1 %v251_v45  ;;  %709 = vmatprep.mubr.bf16.mxu0 %v251_v45 }
 0x135   :  { %669 = vmatmul.mubr.bf16.vlgmr.msra.gmra.mrb[0].mxu1 %v250_v48  ;;  %710 = vmatmul.mubr.bf16.vlgmr.msra.gmra.mrb[4].mxu0 %v250_v48 }
 0x136   :  { %1260 = vmatpush3.bf16.msra.mxu1 %v1437_v46  ;;  %1282 = vmatpush3.bf16.msra.mxu0 %v1438_v47 }
 0x137   :  { %1261 = vmatprep.subr.bf16.mxu1 %v1439_v49  ;;  %1283 = vmatprep.subr.bf16.mxu0 %v1440_v50  ;;  %v1226_v50 = vld [vmem:[%s1700_s6] ss:$0 sm:$0xff] }
 0x13a   :  { %1262 = vmatpush3.bf16.msra.mxu1 %v1441_v51  ;;  %1284 = vmatpush3.bf16.msra.mxu0 %v1442_v52 }
 0x13b   :  { %1263 = vmatprep.subr.bf16.mxu1 %v1443_v53  ;;  %1285 = vmatprep.subr.bf16.mxu0 %v1444_v54 }
 0x13e   :  { %1264 = vmatpush3.bf16.msra.mxu1 %v1445_v55  ;;  %1286 = vmatpush3.bf16.msra.mxu0 %v1446_v56 }
 0x13f   :  { %1265 = vmatprep.subr.bf16.mxu1 %v1447_v57  ;;  %1287 = vmatprep.subr.bf16.mxu0 %v1448_v58 }
 0x142   :  { %1266 = vmatpush3.bf16.msra.mxu1 %v1449_v59  ;;  %1288 = vmatpush3.bf16.msra.mxu0 %v1450_v60 }
 0x143   :  { %1267 = vmatprep.subr.bf16.mxu1 %v1451_v61  ;;  %1289 = vmatprep.subr.bf16.mxu0 %v1452_v62 }
 0x146   :  { %1268 = vmatpush3.bf16.msra.mxu1 %v1453_v63  ;;  %1290 = vmatpush3.bf16.msra.mxu0 %v1454_v1 }
 0x147   :  { %1269 = vmatprep.subr.bf16.mxu1 %v1455_v2  ;;  %1291 = vmatprep.subr.bf16.mxu0 %v1456_v3 }
 0x14a   :  { %1270 = vmatpush3.bf16.msra.mxu1 %v1457_v4  ;;  %1292 = vmatpush3.bf16.msra.mxu0 %v1458_v5 }
 0x14b   :  { %1271 = vmatprep.subr.bf16.mxu1 %v1459_v6  ;;  %1293 = vmatprep.subr.bf16.mxu0 %v1460_v7 }
 0x14e   :  { %1272 = vmatpush3.bf16.msra.mxu1 %v1461_v8  ;;  %1294 = vmatpush3.bf16.msra.mxu0 %v1462_v9 }
 0x14f   :  { %1273 = vmatprep.subr.bf16.mxu1 %v1463_v10  ;;  %1295 = vmatprep.subr.bf16.mxu0 %v1464_v11 }
 0x152   :  { %1274 = vmatpush3.bf16.msra.mxu1 %v1465_v12  ;;  %1296 = vmatpush3.bf16.msra.mxu0 %v1466_v13 }
 0x208   :  { %v670_v26 = vpop.f32.mrb[0].mxu1  ;;  %v711_v27 = vpop.f32.mrb[4].mxu0 }
 0x209   :  { %v718_v31 = vpack.c.bf16 %v670_v26, %v670_v26  ;;  %v720_v32 = vpack.c.bf16 %v711_v27, %v711_v27  ;;  %v672_v34 = vpop.f32.mrb[1].mxu1  ;;  %v713_v28 = vpop.f32.mrb[5].mxu0 }
 0x20a   :  { %v719_v35 = vpack.c.bf16 %v672_v34, %v672_v34  ;;  %v721_v36 = vpack.c.bf16 %v713_v28, %v713_v28  ;;  %v674_v37 = vpop.f32.mrb[2].mxu1  ;;  %v715_v38 = vpop.f32.mrb[6].mxu0 }
 0x20b   :  { %v776_v39 = vadd.bf16 %v754_v24, %v718_v31  ;;  %v778_v40 = vadd.bf16 %v768_v25, %v720_v32  ;;  %v675_v41 = vpop.f32.mrb[3].mxu1  ;;  %v716_v42 = vpop.f32.mrb[7].mxu0 }
 0x20c   :  { %v777_v43 = vadd.bf16 %v761_v29, %v719_v35  ;;  %v779_v44 = vadd.bf16 %v775_v30, %v721_v36 }
 0x20d   :  { %v780_v33 = vmax.bf16 %v1570_v0, %v776_v39  ;;  %v782_v47 = vmax.bf16 %v1570_v0, %v778_v40 }
 0x20e   :  { %v781_v45 = vmax.bf16 %v1570_v0, %v777_v43  ;;  %v783_v46 = vmax.bf16 %v1570_v0, %v779_v44 }
 0x210   :  { %1079 = vmatprep.mubr.bf16.mxu1 %v781_v45  ;;  %1119 = vmatprep.mubr.bf16.mxu0 %v783_v46 }
 0x211   :  { %1080 = vmatmul.mubr.bf16.vlgmr.msra.gmra.mrb[4].mxu1 %v780_v33  ;;  %1120 = vmatmul.mubr.bf16.vlgmr.msra.gmra.mrb[8].mxu0 %v782_v47 }
 0x2e4   :  { %v1275_v48 = vpop.f32.mrb[4].mxu1  ;;  %v1297_v49 = vpop.f32.mrb[8].mxu0 }
 0x2e5   :  { %v1276_v51 = vpop.f32.mrb[5].mxu1  ;;  %v1298_v52 = vpop.f32.mrb[9].mxu0 }
 0x2e6   :  { %v1277_v53 = vadd.f32 %v1276_v51, %v1275_v48  ;;  %v1299_v54 = vadd.f32 %v1298_v52, %v1297_v49  ;;  %v1278_v55 = vpop.f32.mrb[6].mxu1  ;;  %v1300_v56 = vpop.f32.mrb[10].mxu0 }
 0x2e7   :  { %v1279_v57 = vpop.f32.mrb[7].mxu1  ;;  %v1301_v58 = vpop.f32.mrb[11].mxu0 }
 0x2e8   :  { %v1082_v0 = vadd.f32 %v1277_v53, %v1226_v50 }
 0x2ea   :  { %v1122_v59 = vadd.f32 %v1299_v54, %v1082_v0 }
 0x2ec   :  { %1127 = vst [vmem:[#allocation8] sm:$0xff] %v1122_v59 }
 0x2ed   :  { %1544 = shalt.err (!%p1541_p0)
}
 0x2ee   :  { %s1545_s25 = scalar_lea.hbm %s1701_s7, 128 }
 0x2ef   :  { %p1546_p1 = scmp.ne.s32.totalorder %s1701_s7, %s1545_s25  ;;  %p1549_p2 = scmp.lt.u32.totalorder %s1545_s25, %s1701_s7 }
 0x2f1   :  { %p1551_p3 = pnand %p1549_p2, %p1546_p1 }
 0x2f3   :  { %1554 = shalt.err (!%p1551_p3)
}
 0x2f4   :  { %1137 = dma.vmem_to_hbm [thread:$0]  %s1135_s23, 128, %s1701_s7, [#allocation4]  }
 0x2f5   :  { %1559 = dma.done.wait [#allocation4], 128  }
 0x2f6   :  { %1560 = vsyncadd [#allocation4], 4294967168 }
 0x2f7   :  { %1141 = vsyncpa [#allocation3], 1 }
 0x2f8   :  { %1142 = vsyncpa [#allocation6], 1 }
 0x2f9   :  { %1143 = vsyncpa [#allocation4], 1 }

</bundles_post_ra>
